<compile_context>
chip_gen: v6e
topology: v6e:2x2x1
jax: 0.10.0
libtpu: 0.0.40
codegen_flags: <defaults>
</compile_context>

<pallas_src>
import functools

import jax
import jax.numpy as jnp
from jax.experimental import pallas as pl
from jax.experimental.pallas import tpu as pltpu

IN_DIM = 5
HID = 128
OUT_DIM = 3
PAD_OUT = 128          # fc3 padded to full lane width
NEG_BIG = -1e30        # padded-logit bias -> exp() underflows to exactly 0


def _round_up(n, m):
    return ((n + m - 1) // m) * m


def policy_mlp_kernel(x_ref, w1_ref, b1_ref, w2_ref, b2_ref, w3_ref, b3_ref, o_ref):
    x = x_ref[...].astype(jnp.float32)                       # (TB, 5)

    # fc1 + ReLU  (K=5 matmul; neutral at these sizes — see notes)
    h1 = jnp.dot(x, w1_ref[...], preferred_element_type=jnp.float32) + b1_ref[...]
    h1 = jnp.maximum(h1, 0.0)

    # fc2 + ReLU  (the only "real" MXU work: 128x128)
    h2 = jnp.dot(h1, w2_ref[...], preferred_element_type=jnp.float32) + b2_ref[...]
    h2 = jnp.maximum(h2, 0.0)

    # fc3, padded to 128 lanes: columns 3..127 have zero weights and -1e30 bias,
    # so they vanish under softmax and the store is a full-width unmasked vst.
    logits = jnp.dot(h2, w3_ref[...], preferred_element_type=jnp.float32) + b3_ref[...]

    # numerically-stable softmax over the last axis (PyTorch dim=1)
    m = jnp.max(logits, axis=-1, keepdims=True)
    e = jnp.exp(logits - m)                                  # padded lanes -> exactly 0
    denom = jnp.sum(e, axis=-1, keepdims=True)
    o_ref[...] = (e * pl.reciprocal(denom, approx=True)).astype(o_ref.dtype)


def policy_forward(x, params, *, block_b=1024):
    """x: [B, 5] float32 -> action probabilities [B, 3] float32."""
    w1, b1, w2, b2, w3p, b3p = params
    B = x.shape[0]

    # Batch tile: multiple of 8 sublanes, capped at block_b (VMEM-friendly on v7x).
    TB = min(_round_up(block_b, 8), _round_up(B, 8))
    B_pad = _round_up(B, TB)
    if B_pad != B:
        x = jnp.pad(x, ((0, B_pad - B), (0, 0)))

    grid = (B_pad // TB,)
    out = pl.pallas_call(
        policy_mlp_kernel,
        out_shape=jax.ShapeDtypeStruct((B_pad, PAD_OUT), jnp.float32),
        grid=grid,
        in_specs=[
            pl.BlockSpec((TB, IN_DIM), lambda i: (i, 0)),        # x tile (pipelined)
            pl.BlockSpec((IN_DIM, HID), lambda i: (0, 0)),       # w1 (resident)
            pl.BlockSpec((1, HID), lambda i: (0, 0)),            # b1
            pl.BlockSpec((HID, HID), lambda i: (0, 0)),          # w2
            pl.BlockSpec((1, HID), lambda i: (0, 0)),            # b2
            pl.BlockSpec((HID, PAD_OUT), lambda i: (0, 0)),      # w3 (padded)
            pl.BlockSpec((1, PAD_OUT), lambda i: (0, 0)),        # b3 (padded)
        ],
        out_specs=pl.BlockSpec((TB, PAD_OUT), lambda i: (i, 0)),
        compiler_params=pltpu.CompilerParams(
            dimension_semantics=("parallel",),                   # megacore on v7x
        ),
    )(x, w1, b1, w2, b2, w3p, b3p)
    return out[:B, :OUT_DIM]


def init_params(key):
    """Deterministic init matching nn.Linear fan-in bounds.
    Weights stored transposed [in, out]; fc3 padded to 128 output lanes."""
    k1, k2, k3, k4, k5, k6 = jax.random.split(key, 6)

    def uniform(k, shape, fan_in):
        bound = 1.0 / jnp.sqrt(float(fan_in))
        return jax.random.uniform(k, shape, jnp.float32, -bound, bound)

    w1 = uniform(k1, (IN_DIM, HID), IN_DIM)
    b1 = uniform(k2, (1, HID), IN_DIM)
    w2 = uniform(k3, (HID, HID), HID)
    b2 = uniform(k4, (1, HID), HID)
    w3 = uniform(k5, (HID, OUT_DIM), HID)
    b3 = uniform(k6, (1, OUT_DIM), HID)

    # Pad fc3 to full lane width: zero weights, huge-negative bias on pad lanes.
    w3p = jnp.pad(w3, ((0, 0), (0, PAD_OUT - OUT_DIM)))
    b3p = jnp.concatenate(
        [b3, jnp.full((1, PAD_OUT - OUT_DIM), NEG_BIG, jnp.float32)], axis=1
    )
    return (w1, b1, w2, b2, w3p, b3p)


def policy_reference(x, params):
    """Pure-JAX reference of the PyTorch forward pass."""
    w1, b1, w2, b2, w3p, b3p = params
    h1 = jax.nn.relu(x @ w1 + b1)
    h2 = jax.nn.relu(h1 @ w2 + b2)
    logits = h2 @ w3p[:, :OUT_DIM] + b3p[:, :OUT_DIM]
    return jax.nn.softmax(logits, axis=1)


if __name__ == "__main__":
    key = jax.random.PRNGKey(0)
    pkey, xkey1, xkey2 = jax.random.split(key, 3)
    params = init_params(pkey)

    # Small batch (single grid step).
    x = jax.random.normal(xkey1, (8, IN_DIM), dtype=jnp.float32)
    probs = jax.block_until_ready(policy_forward(x, params))
    assert probs.shape == (8, OUT_DIM)
    assert bool(jnp.all(jnp.abs(jnp.sum(probs, axis=1) - 1.0) < 5e-3))
    ref = policy_reference(x, params)
    assert bool(jnp.all(jnp.abs(probs - ref) < 5e-3))

    # Unaligned batch with a multi-step grid (exercises padding + pipelining).
    x2 = jax.random.normal(xkey2, (40, IN_DIM), dtype=jnp.float32)
    probs2 = jax.block_until_ready(policy_forward(x2, params, block_b=16))
    assert probs2.shape == (40, OUT_DIM)
    assert bool(jnp.all(jnp.abs(jnp.sum(probs2, axis=1) - 1.0) < 5e-3))
    ref2 = policy_reference(x2, params)
    assert bool(jnp.all(jnp.abs(probs2 - ref2) < 5e-3))

    print("KERNEL_OK")
</pallas_src>

<mosaic_0001>
module attributes {stable_mosaic.version = 11 : i64} {
  func.func @policy_mlp_kernel(%arg0: i32, %arg1: memref<8x5xf32, #tpu.memory_space<vmem>>, %arg2: memref<5x128xf32, #tpu.memory_space<vmem>>, %arg3: memref<1x128xf32, #tpu.memory_space<vmem>>, %arg4: memref<128x128xf32, #tpu.memory_space<vmem>>, %arg5: memref<1x128xf32, #tpu.memory_space<vmem>>, %arg6: memref<128x128xf32, #tpu.memory_space<vmem>>, %arg7: memref<1x128xf32, #tpu.memory_space<vmem>>, %arg8: memref<8x128xf32, #tpu.memory_space<vmem>>) attributes {dimension_semantics = [#tpu.dimension_semantics<parallel>], iteration_bounds = array<i64: 1>, scalar_prefetch = 0 : i64, scratch_operands = 0 : i64, tpu.core_type = #tpu.core_type<tc>, window_params = [{transform_indices = @transform_0, window_bounds = array<i64: 8, 5>}, {pipeline_mode = #tpu.pipeline_mode<synchronous>, transform_indices = @transform_1, window_bounds = array<i64: 5, 128>}, {pipeline_mode = #tpu.pipeline_mode<synchronous>, transform_indices = @transform_2, window_bounds = array<i64: 1, 128>}, {pipeline_mode = #tpu.pipeline_mode<synchronous>, transform_indices = @transform_3, window_bounds = array<i64: 128, 128>}, {pipeline_mode = #tpu.pipeline_mode<synchronous>, transform_indices = @transform_4, window_bounds = array<i64: 1, 128>}, {pipeline_mode = #tpu.pipeline_mode<synchronous>, transform_indices = @transform_5, window_bounds = array<i64: 128, 128>}, {pipeline_mode = #tpu.pipeline_mode<synchronous>, transform_indices = @transform_6, window_bounds = array<i64: 1, 128>}, {transform_indices = @transform_7, window_bounds = array<i64: 8, 128>}]} {
    %c0 = arith.constant 0 : index
    %c0_0 = arith.constant 0 : index
    %0 = vector.load %arg1[%c0, %c0_0] : memref<8x5xf32, #tpu.memory_space<vmem>>, vector<8x5xf32>
    %c0_1 = arith.constant 0 : index
    %c0_2 = arith.constant 0 : index
    %1 = vector.load %arg2[%c0_1, %c0_2] : memref<5x128xf32, #tpu.memory_space<vmem>>, vector<5x128xf32>
    %cst = arith.constant dense<0.000000e+00> : vector<8x128xf32>
    %2 = tpu.matmul %0, %1, %cst {dimension_numbers = #tpu.dot_dimension_numbers<[1], [0], [0], [1], [0, 0, 1, 1], [], []>} : vector<8x5xf32>, vector<5x128xf32>, vector<8x128xf32> -> vector<8x128xf32>
    %c0_3 = arith.constant 0 : index
    %c0_4 = arith.constant 0 : index
    %3 = vector.load %arg3[%c0_3, %c0_4] : memref<1x128xf32, #tpu.memory_space<vmem>>, vector<1x128xf32>
    %4 = vector.broadcast %3 : vector<1x128xf32> to vector<8x128xf32>
    %5 = arith.addf %2, %4 : vector<8x128xf32>
    %cst_5 = arith.constant 0.000000e+00 : f32
    %6 = vector.broadcast %cst_5 : f32 to vector<8x128xf32>
    %7 = arith.maximumf %5, %6 : vector<8x128xf32>
    %c0_6 = arith.constant 0 : index
    %c0_7 = arith.constant 0 : index
    %8 = vector.load %arg4[%c0_6, %c0_7] : memref<128x128xf32, #tpu.memory_space<vmem>>, vector<128x128xf32>
    %cst_8 = arith.constant dense<0.000000e+00> : vector<8x128xf32>
    %9 = tpu.matmul %7, %8, %cst_8 {dimension_numbers = #tpu.dot_dimension_numbers<[1], [0], [0], [1], [0, 0, 1, 1], [], []>} : vector<8x128xf32>, vector<128x128xf32>, vector<8x128xf32> -> vector<8x128xf32>
    %c0_9 = arith.constant 0 : index
    %c0_10 = arith.constant 0 : index
    %10 = vector.load %arg5[%c0_9, %c0_10] : memref<1x128xf32, #tpu.memory_space<vmem>>, vector<1x128xf32>
    %11 = vector.broadcast %10 : vector<1x128xf32> to vector<8x128xf32>
    %12 = arith.addf %9, %11 : vector<8x128xf32>
    %cst_11 = arith.constant 0.000000e+00 : f32
    %13 = vector.broadcast %cst_11 : f32 to vector<8x128xf32>
    %14 = arith.maximumf %12, %13 : vector<8x128xf32>
    %c0_12 = arith.constant 0 : index
    %c0_13 = arith.constant 0 : index
    %15 = vector.load %arg6[%c0_12, %c0_13] : memref<128x128xf32, #tpu.memory_space<vmem>>, vector<128x128xf32>
    %cst_14 = arith.constant dense<0.000000e+00> : vector<8x128xf32>
    %16 = tpu.matmul %14, %15, %cst_14 {dimension_numbers = #tpu.dot_dimension_numbers<[1], [0], [0], [1], [0, 0, 1, 1], [], []>} : vector<8x128xf32>, vector<128x128xf32>, vector<8x128xf32> -> vector<8x128xf32>
    %c0_15 = arith.constant 0 : index
    %c0_16 = arith.constant 0 : index
    %17 = vector.load %arg7[%c0_15, %c0_16] : memref<1x128xf32, #tpu.memory_space<vmem>>, vector<1x128xf32>
    %18 = vector.broadcast %17 : vector<1x128xf32> to vector<8x128xf32>
    %19 = arith.addf %16, %18 : vector<8x128xf32>
    %cst_17 = arith.constant dense<0xFF800000> : vector<8xf32>
    %20 = vector.multi_reduction <maximumf>, %19, %cst_17 [1] : vector<8x128xf32> to vector<8xf32>
    %21 = vector.shape_cast %20 : vector<8xf32> to vector<8x1xf32>
    %22 = vector.broadcast %21 : vector<8x1xf32> to vector<8x128xf32>
    %23 = arith.subf %19, %22 : vector<8x128xf32>
    %24 = math.exp %23 : vector<8x128xf32>
    %cst_18 = arith.constant dense<0.000000e+00> : vector<8xf32>
    %25 = vector.multi_reduction <add>, %24, %cst_18 [1] : vector<8x128xf32> to vector<8xf32>
    %26 = vector.shape_cast %25 : vector<8xf32> to vector<8x1xf32>
    %27 = tpu.reciprocal %26 {approx = true} : vector<8x1xf32> -> vector<8x1xf32>
    %28 = vector.broadcast %27 : vector<8x1xf32> to vector<8x128xf32>
    %29 = arith.mulf %24, %28 : vector<8x128xf32>
    %c0_19 = arith.constant 0 : index
    %c0_20 = arith.constant 0 : index
    %30 = vector.load %arg8[%c0_19, %c0_20] : memref<8x128xf32, #tpu.memory_space<vmem>>, vector<8x128xf32>
    tpu.vector_store %arg8[%c0_19, %c0_20], %29 {strides = array<i32>} : memref<8x128xf32, #tpu.memory_space<vmem>>, vector<8x128xf32>,
    return
  }
  func.func @transform_0(%arg0: i32) -> (i32, i32) {
    %c0_i32 = arith.constant 0 : i32
    %c0_i32_0 = arith.constant 0 : i32
    return %arg0, %c0_i32 : i32, i32
  }
  func.func @transform_1(%arg0: i32) -> (i32, i32) {
    %c0_i32 = arith.constant 0 : i32
    %c0_i32_0 = arith.constant 0 : i32
    %c0_i32_1 = arith.constant 0 : i32
    return %c0_i32, %c0_i32_0 : i32, i32
  }
  func.func @transform_2(%arg0: i32) -> (i32, i32) {
    %c0_i32 = arith.constant 0 : i32
    %c0_i32_0 = arith.constant 0 : i32
    %c0_i32_1 = arith.constant 0 : i32
    return %c0_i32, %c0_i32_0 : i32, i32
  }
  func.func @transform_3(%arg0: i32) -> (i32, i32) {
    %c0_i32 = arith.constant 0 : i32
    %c0_i32_0 = arith.constant 0 : i32
    %c0_i32_1 = arith.constant 0 : i32
    return %c0_i32, %c0_i32_0 : i32, i32
  }
  func.func @transform_4(%arg0: i32) -> (i32, i32) {
    %c0_i32 = arith.constant 0 : i32
    %c0_i32_0 = arith.constant 0 : i32
    %c0_i32_1 = arith.constant 0 : i32
    return %c0_i32, %c0_i32_0 : i32, i32
  }
  func.func @transform_5(%arg0: i32) -> (i32, i32) {
    %c0_i32 = arith.constant 0 : i32
    %c0_i32_0 = arith.constant 0 : i32
    %c0_i32_1 = arith.constant 0 : i32
    return %c0_i32, %c0_i32_0 : i32, i32
  }
  func.func @transform_6(%arg0: i32) -> (i32, i32) {
    %c0_i32 = arith.constant 0 : i32
    %c0_i32_0 = arith.constant 0 : i32
    %c0_i32_1 = arith.constant 0 : i32
    return %c0_i32, %c0_i32_0 : i32, i32
  }
  func.func @transform_7(%arg0: i32) -> (i32, i32) {
    %c0_i32 = arith.constant 0 : i32
    %c0_i32_0 = arith.constant 0 : i32
    return %arg0, %c0_i32 : i32, i32
  }
}

</mosaic_0001>

<bundles_post_ra>
// kernel: tpu_custom_call.1
= control target key start
LH: loop header
LB: loop body
LE: loop exit
PB: predicated region body
PF: predicated region fallthrough
CT: control target
= control target key end

     0   :  { %12 = vsyncpa [#allocation3], 0  ;;  %s729_s0 = inlined_call_operand.hbm [shape: f32[8,5], index: 0, kind: input, shape index: {}]   ;;  %s730_s1 = inlined_call_operand.hbm [shape: f32[5,128], index: 1, kind: input, shape index: {}]   ;;  %s731_s2 = inlined_call_operand.vmem [shape: f32[1,128], index: 2, kind: input, shape index: {}]   ;;  %s732_s3 = inlined_call_operand.hbm [shape: f32[128,128], index: 3, kind: input, shape index: {}]   ;;  %s733_s4 = inlined_call_operand.vmem [shape: f32[1,128], index: 4, kind: input, shape index: {}]   ;;  %s734_s5 = inlined_call_operand.hbm [shape: f32[128,128], index: 5, kind: input, shape index: {}]   ;;  %s735_s6 = inlined_call_operand.vmem [shape: f32[1,128], index: 6, kind: input, shape index: {}]   ;;  %s736_s7 = inlined_call_operand.hbm [shape: f32[8,128], index: 7, kind: output, shape index: {}]  }
   0x1   :  { %13 = vsyncpa [#allocation6], 0 }
   0x2   :  { %14 = vsyncpa [#allocation9], 0 }
   0x3   :  { %15 = vsyncpa [#allocation4], 0  ;;  %s617_s24 = smov [#allocation5]   ;;  %s618_s26 = smov [#allocation2]  }
   0x4   :  { %s32_s25 = sshll.u32 %s617_s24, 4  ;;  %s22_s27 = sshll.u32 %s618_s26, 4  ;;  %s33_s25 = int_to_ptr.vmem [resolvable:$true] %s32_s25  ;;  %s23_s27 = int_to_ptr.vmem [resolvable:$true] %s22_s27 }
   0x5   :  { %s517_s28 = scalar_lea.vmem %s33_s25, 128  ;;  %p522_p1 = scmp.lt.s32.totalorder %s33_s25, %s33_s25 }
   0x6   :  { %p518_p0 = scmp.ne.s32.totalorder %s33_s25, %s517_s28  ;;  %p523_p2 = scmp.lt.s32.totalorder %s517_s28, %s517_s28 }
   0x8   :  { %p524_p3 = por %p523_p2, %p522_p1 }
   0xa   :  { %p525_p4 = pnand %p524_p3, %p518_p0 }
   0xc   :  { %528 = shalt.err (!%p525_p4)
}
   0xd   :  { %35 = dma.hbm_to_vmem [thread:$0]  %s730_s1, 128, %s33_s25, [#allocation6]  }
   0xe   :  { %s537_s8 = scalar_lea.vmem %s23_s27, 128  ;;  %p542_p6 = scmp.lt.s32.totalorder %s23_s27, %s23_s27 }
   0xf   :  { %p538_p5 = scmp.ne.s32.totalorder %s23_s27, %s537_s8  ;;  %p543_p7 = scmp.lt.s32.totalorder %s537_s8, %s537_s8 }
  0x11   :  { %p544_p8 = por %p543_p7, %p542_p6 }
  0x13   :  { %p545_p9 = pnand %p544_p8, %p538_p5 }
  0x15   :  { %548 = shalt.err (!%p545_p9)
}
  0x16   :  { %25 = dma.hbm_to_vmem [thread:$0]  %s729_s0, 128, %s23_s27, [#allocation3]  }
  0x17   :  { %s619_s11 = smov [#allocation7]  }
  0x18   :  { %s43_s12 = sshll.u32 %s619_s11, 4  ;;  %s44_s12 = int_to_ptr.vmem [resolvable:$true] %s43_s12 }
  0x19   :  { %s557_s13 = scalar_lea.vmem %s44_s12, 2048  ;;  %p562_p11 = scmp.lt.s32.totalorder %s44_s12, %s44_s12 }
  0x1a   :  { %p558_p10 = scmp.ne.s32.totalorder %s44_s12, %s557_s13  ;;  %p563_p12 = scmp.lt.s32.totalorder %s557_s13, %s557_s13 }
  0x1c   :  { %p564_p13 = por %p563_p12, %p562_p11 }
  0x1e   :  { %p565_p0 = pnand %p564_p13, %p558_p10 }
  0x20   :  { %568 = shalt.err (!%p565_p0)
}
  0x21   :  { %s620_s1 = smov 128   ;;  %s621_s14 = smov 8  }
  0x22   :  { %49 = dma.hbm_to_vmem [thread:$0]  %s732_s3, 2048, %s44_s12, [#allocation6], %s620_s1, %s620_s1, %s621_s14  }
  0x23   :  { %s622_s17 = smov [#allocation8]  }
  0x24   :  { %s57_s18 = sshll.u32 %s622_s17, 4  ;;  %s58_s18 = int_to_ptr.vmem [resolvable:$true] %s57_s18 }
  0x25   :  { %s577_s0 = scalar_lea.vmem %s58_s18, 2048  ;;  %p582_p2 = scmp.lt.s32.totalorder %s58_s18, %s58_s18 }
  0x26   :  { %p578_p1 = scmp.ne.s32.totalorder %s58_s18, %s577_s0  ;;  %p583_p3 = scmp.lt.s32.totalorder %s577_s0, %s577_s0 }
  0x28   :  { %p584_p4 = por %p583_p3, %p582_p2 }
  0x2a   :  { %p585_p5 = pnand %p584_p4, %p578_p1 }
  0x2c   :  { %588 = shalt.err (!%p585_p5)
}
  0x2d   :  { %63 = dma.hbm_to_vmem [thread:$0]  %s734_s5, 2048, %s58_s18, [#allocation9], %s620_s1, %s620_s1, %s621_s14  }
  0x2e   :  { %609 = dma.done.wait [#allocation3], 128  }
  0x2f   :  { %610 = vsyncadd [#allocation3], 4294967168 }
  0x30   :  { %611 = dma.done.wait [#allocation6], 2176  }
  0x31   :  { %612 = vsyncadd [#allocation6], 4294965120 }
  0x32   :  { %613 = dma.done.wait [#allocation9], 2048  }
  0x33   :  { %614 = vsyncadd [#allocation9], 4294965248  ;;  %v623_v0 = vmov 0.0   ;;  %vm624_vm0 = vmmov 0   ;;  %vm91_vm1 = vcmask 1044480   ;;  %vm87_vm2 = vcmask 39936  }
  0x34   :  { %421 = vmatprep.subr.mxu0 %v623_v0  ;;  %423 = vmatprep.mubr.msk.f32.mxu0 %vm624_vm0, %v623_v0  ;;  %v79_v1 = vld [vmem:[#allocation5] sm:$0x1f]  ;;  %v78_v2 = vld [vmem:[#allocation2] sm:$0xff]  ;;  %v179_v5 = vld [vmem:[#allocation7 + $0x68] sm:$0xff] }
  0x35   :  { %426 = vmatprep.subr.mxu1 %v623_v0  ;;  %458 = vmatprep.mubr.msk.f32.mxu1 %vm624_vm0, %v623_v0  ;;  %v181_v3 = vld [vmem:[#allocation7 + $0x78] sm:$0xff]  ;;  %v180_v4 = vld [vmem:[#allocation7 + $0x70] sm:$0xff]  ;;  %v178_v6 = vld [vmem:[#allocation7 + $0x60] sm:$0xff] }
  0x36   :  { %422 = vmatpush3.msk.msra.mxu0 %vm91_vm1, %v79_v1  ;;  %427 = vmatpush3.msra.mxu1 %v181_v3  ;;  %v177_v7 = vld [vmem:[#allocation7 + $0x58] sm:$0xff]  ;;  %v176_v8 = vld [vmem:[#allocation7 + $0x50] sm:$0xff]  ;;  %v175_v9 = vld [vmem:[#allocation7 + $0x48] sm:$0xff] }
  0x37   :  { %424 = vmatmul.mubr.msk.f32.vlgmr.msra.gmra.mxu0 %vm87_vm2, %v78_v2  ;;  %428 = vmatprep.subr.mxu1 %v623_v0  ;;  %v174_v10 = vld [vmem:[#allocation7 + $0x40] sm:$0xff]  ;;  %v173_v11 = vld [vmem:[#allocation7 + $0x38] sm:$0xff]  ;;  %v172_v12 = vld [vmem:[#allocation7 + $0x30] sm:$0xff] }
  0x38   :  { %429 = vmatpush3.msra.mxu1 %v180_v4  ;;  %461 = vmatprep.subr.mxu0 %v623_v0  ;;  %v171_v13 = vld [vmem:[#allocation7 + $0x28] sm:$0xff]  ;;  %v170_v14 = vld [vmem:[#allocation7 + $0x20] sm:$0xff]  ;;  %v169_v15 = vld [vmem:[#allocation7 + $0x18] sm:$0xff] }
  0x39   :  { %430 = vmatprep.subr.mxu1 %v623_v0  ;;  %493 = vmatprep.mubr.msk.f32.mxu0 %vm624_vm0, %v623_v0  ;;  %v168_v16 = vld [vmem:[#allocation7 + $0x10] sm:$0xff]  ;;  %v167_v17 = vld [vmem:[#allocation7 + $0x8] sm:$0xff]  ;;  %v166_v18 = vld [vmem:[#allocation7] sm:$0xff] }
  0x3a   :  { %431 = vmatpush3.msra.mxu1 %v179_v5  ;;  %v275_v19 = vld [vmem:[#allocation8 + $0x78] sm:$0xff]  ;;  %v274_v20 = vld [vmem:[#allocation8 + $0x70] sm:$0xff]  ;;  %v273_v21 = vld [vmem:[#allocation8 + $0x68] sm:$0xff] }
  0x3b   :  { %432 = vmatprep.subr.mxu1 %v623_v0  ;;  %462 = vmatpush3.msra.mxu0 %v275_v19  ;;  %v272_v22 = vld [vmem:[#allocation8 + $0x60] sm:$0xff]  ;;  %v271_v23 = vld [vmem:[#allocation8 + $0x58] sm:$0xff]  ;;  %v270_v24 = vld [vmem:[#allocation8 + $0x50] sm:$0xff] }
  0x3c   :  { %433 = vmatpush3.msra.mxu1 %v178_v6  ;;  %463 = vmatprep.subr.mxu0 %v623_v0  ;;  %v269_v25 = vld [vmem:[#allocation8 + $0x48] sm:$0xff]  ;;  %v268_v26 = vld [vmem:[#allocation8 + $0x40] sm:$0xff]  ;;  %v267_v27 = vld [vmem:[#allocation8 + $0x38] sm:$0xff] }
  0x3d   :  { %434 = vmatprep.subr.mxu1 %v623_v0  ;;  %464 = vmatpush3.msra.mxu0 %v274_v20  ;;  %v266_v28 = vld [vmem:[#allocation8 + $0x30] sm:$0xff]  ;;  %v265_v29 = vld [vmem:[#allocation8 + $0x28] sm:$0xff]  ;;  %v264_v30 = vld [vmem:[#allocation8 + $0x20] sm:$0xff] }
  0x3e   :  { %435 = vmatpush3.msra.mxu1 %v177_v7  ;;  %465 = vmatprep.subr.mxu0 %v623_v0  ;;  %v263_v31 = vld [vmem:[#allocation8 + $0x18] sm:$0xff]  ;;  %v380_v32 = vld [vmem:[%s731_s2] ss:$0 sm:$0xff]  ;;  %v261_v38 = vld [vmem:[#allocation8 + $0x8] sm:$0xff] }
  0x3f   :  { %436 = vmatprep.subr.mxu1 %v623_v0  ;;  %466 = vmatpush3.msra.mxu0 %v273_v21  ;;  %v262_v37 = vld [vmem:[#allocation8 + $0x10] sm:$0xff]  ;;  %v260_v39 = vld [vmem:[#allocation8] sm:$0xff] }
  0x40   :  { %437 = vmatpush3.msra.mxu1 %v176_v8  ;;  %467 = vmatprep.subr.mxu0 %v623_v0  ;;  %v383_v40 = vld [vmem:[%s733_s4] ss:$0 sm:$0xff]  ;;  %s625_s4 = smov [#allocation10]  }
  0x41   :  { %438 = vmatprep.subr.mxu1 %v623_v0  ;;  %468 = vmatpush3.msra.mxu0 %v272_v22  ;;  %v384_v45 = vld [vmem:[%s735_s6] ss:$0 sm:$0xff]  ;;  %s369_s24 = sshll.u32 %s625_s4, 4  ;;  %s370_s24 = int_to_ptr.vmem [resolvable:$true] %s369_s24 }
  0x42   :  { %439 = vmatpush3.msra.mxu1 %v175_v9  ;;  %469 = vmatprep.subr.mxu0 %v623_v0  ;;  %s589_s25 = scalar_lea.vmem %s370_s24, 128  ;;  %p594_p7 = scmp.lt.s32.totalorder %s370_s24, %s370_s24 }
  0x43   :  { %440 = vmatprep.subr.mxu1 %v623_v0  ;;  %470 = vmatpush3.msra.mxu0 %v271_v23  ;;  %p590_p6 = scmp.ne.s32.totalorder %s370_s24, %s589_s25  ;;  %p595_p8 = scmp.lt.s32.totalorder %s589_s25, %s589_s25 }
  0x44   :  { %441 = vmatpush3.msra.mxu1 %v174_v10  ;;  %471 = vmatprep.subr.mxu0 %v623_v0 }
  0x45   :  { %442 = vmatprep.subr.mxu1 %v623_v0  ;;  %472 = vmatpush3.msra.mxu0 %v270_v24  ;;  %p596_p9 = por %p595_p8, %p594_p7 }
  0x46   :  { %443 = vmatpush3.msra.mxu1 %v173_v11  ;;  %473 = vmatprep.subr.mxu0 %v623_v0 }
  0x47   :  { %444 = vmatprep.subr.mxu1 %v623_v0  ;;  %474 = vmatpush3.msra.mxu0 %v269_v25  ;;  %p597_p10 = pnand %p596_p9, %p590_p6 }
  0x48   :  { %445 = vmatpush3.msra.mxu1 %v172_v12  ;;  %475 = vmatprep.subr.mxu0 %v623_v0 }
  0x49   :  { %446 = vmatprep.subr.mxu1 %v623_v0  ;;  %476 = vmatpush3.msra.mxu0 %v268_v26 }
  0x4a   :  { %447 = vmatpush3.msra.mxu1 %v171_v13  ;;  %477 = vmatprep.subr.mxu0 %v623_v0 }
  0x4b   :  { %448 = vmatprep.subr.mxu1 %v623_v0  ;;  %478 = vmatpush3.msra.mxu0 %v267_v27 }
  0x4c   :  { %449 = vmatpush3.msra.mxu1 %v170_v14  ;;  %479 = vmatprep.subr.mxu0 %v623_v0 }
  0x4d   :  { %450 = vmatprep.subr.mxu1 %v623_v0  ;;  %480 = vmatpush3.msra.mxu0 %v266_v28 }
  0x4e   :  { %451 = vmatpush3.msra.mxu1 %v169_v15  ;;  %481 = vmatprep.subr.mxu0 %v623_v0 }
  0x4f   :  { %452 = vmatprep.subr.mxu1 %v623_v0  ;;  %482 = vmatpush3.msra.mxu0 %v265_v29 }
  0x50   :  { %453 = vmatpush3.msra.mxu1 %v168_v16  ;;  %483 = vmatprep.subr.mxu0 %v623_v0 }
  0x51   :  { %454 = vmatprep.subr.mxu1 %v623_v0  ;;  %484 = vmatpush3.msra.mxu0 %v264_v30 }
  0x52   :  { %455 = vmatpush3.msra.mxu1 %v167_v17  ;;  %485 = vmatprep.subr.mxu0 %v623_v0 }
  0x53   :  { %456 = vmatprep.subr.mxu1 %v623_v0  ;;  %486 = vmatpush3.msra.mxu0 %v263_v31 }
  0x54   :  { %457 = vmatpush3.msra.mxu1 %v166_v18  ;;  %487 = vmatprep.subr.mxu0 %v623_v0 }
  0x55   :  { %488 = vmatpush3.msra.mxu0 %v262_v37 }
  0x56   :  { %489 = vmatprep.subr.mxu0 %v623_v0 }
  0x57   :  { %490 = vmatpush3.msra.mxu0 %v261_v38 }
  0x58   :  { %491 = vmatprep.subr.mxu0 %v623_v0 }
  0x59   :  { %492 = vmatpush3.msra.mxu0 %v260_v39 }
  0xf7   :  { %v161_v33 = vpop.f32.mrf.mxu0 }
  0xf8   :  { %v162_v34 = vadd.f32 %v380_v32, %v161_v33 }
  0xf9   :  { %v425_v35 = vpop.f32.mrf.mxu0 }
  0xfa   :  { %v165_v36 = vmax.f32 %v162_v34, 0.0 }
  0xfc   :  { %459 = vmatmul.mubr.f32.vlgmr.msra.gmra.mxu1 %v165_v36 }
 0x1bc   :  { %v255_v41 = vpop.f32.mrf.mxu1 }
 0x1bd   :  { %v256_v42 = vadd.f32 %v383_v40, %v255_v41 }
 0x1be   :  { %v460_v43 = vpop.f32.mrf.mxu1 }
 0x1bf   :  { %v259_v44 = vmax.f32 %v256_v42, 0.0 }
 0x1c1   :  { %494 = vmatmul.mubr.f32.vlgmr.msra.gmra.mxu0 %v259_v44 }
 0x281   :  { %v349_v46 = vpop.f32.mrf.mxu0 }
 0x282   :  { %v350_v47 = vadd.f32 %v384_v45, %v349_v46 }
 0x283   :  { %v495_v48 = vpop.f32.mrf.mxu0 }
 0x284   :  { %353 = vmax.xlane.f32.xlu0 %v350_v47 }
 0x30d   :  { %v354_v49 = vpop.xlane.xlu0 %353 }
 0x30e   :  { %v355_v50 = vsub.f32 %v350_v47, %v354_v49 }
 0x310   :  { %v356_v51 = vmul.f32 1.442695, %v355_v50 }
 0x312   :  { %505 = vpow2.f32 %v356_v51 }
 0x31f   :  { %v506_v52 = vpop.eup %505 }
 0x320   :  { %358 = vadd.xlane.f32.xlu0 %v506_v52 }
 0x3a9   :  { %v359_v53 = vpop.xlane.xlu0 %358 }
 0x3aa   :  { %507 = vrcp.f32 %v359_v53 }
 0x3b7   :  { %v508_v54 = vpop.eup %507 }
 0x3b8   :  { %v361_v55 = vmul.f32 %v508_v54, %v506_v52 }
 0x3ba   :  { %362 = vst [vmem:[#allocation10] sm:$0xff] %v361_v55 }
 0x3bb   :  { %600 = shalt.err (!%p597_p10)
}
 0x3bc   :  { %372 = dma.vmem_to_hbm [thread:$0]  %s370_s24, 128, %s736_s7, [#allocation4]  }
 0x3bd   :  { %615 = dma.done.wait [#allocation4], 128  }
 0x3be   :  { %616 = vsyncadd [#allocation4], 4294967168 }
 0x3bf   :  { %376 = vsyncpa [#allocation3], 1 }
 0x3c0   :  { %377 = vsyncpa [#allocation6], 1 }
 0x3c1   :  { %378 = vsyncpa [#allocation9], 1 }
 0x3c2   :  { %379 = vsyncpa [#allocation4], 1 }

</bundles_post_ra>
